<compile_context>
chip_gen: v7x
topology: tpu7x:2x2x1
jax: 0.10.0
libtpu: 0.0.40
codegen_flags: <defaults>
</compile_context>

<pallas_src>
import functools

import jax
import jax.numpy as jnp
from jax.experimental import pallas as pl
from jax.experimental.pallas import tpu as pltpu

P_DROP = 0.2
SCALE = 1.0 / (1.0 - P_DROP)
# Drop iff uniform_u32 < floor(p * 2^32); keep w.p. 1 - p.
DROP_THRESH_U32 = int(P_DROP * (1 << 32))  # 858993459

LANE = 128  # vreg lane width
SUB = 8     # vreg sublane count


def _dropout_kernel(seed_ref, x_ref, o_ref, *, block_rows):
    """Stateless dropout on a [block_rows, 128] lane-dense tile."""
    i = pl.program_id(0)
    shape = x_ref.shape

    # Global element index of every entry in this tile (deterministic and
    # decorrelated regardless of how the slab is tiled).
    row = jax.lax.broadcasted_iota(jnp.int32, shape, 0).astype(jnp.uint32)
    col = jax.lax.broadcasted_iota(jnp.int32, shape, 1).astype(jnp.uint32)
    base = (i * block_rows).astype(jnp.uint32)
    gidx = (base + row) * jnp.uint32(LANE) + col

    # Mix with seed and avalanche (murmur3 fmix32) -> uniform uint32 bits.
    s = seed_ref[0].astype(jnp.uint32)
    h = gidx ^ (s * jnp.uint32(0x9E3779B9) + jnp.uint32(0x7F4A7C15))
    h = h ^ (h >> 16)
    h = h * jnp.uint32(0x85EBCA6B)
    h = h ^ (h >> 13)
    h = h * jnp.uint32(0xC2B2AE35)
    h = h ^ (h >> 16)

    # Integer-threshold keep mask + fused scale/apply (no select, single x read).
    keep = (h >= jnp.uint32(DROP_THRESH_U32)).astype(jnp.float32)
    o_ref[...] = (x_ref[...].astype(jnp.float32)
                  * (keep * jnp.float32(SCALE))).astype(o_ref.dtype)


def flatten_dropout(x, seed: int = 0):
    """torch.flatten(x, 1) followed by training-mode Dropout(p=0.2)."""
    n = x.shape[0]
    x2 = x.reshape(n, -1)            # glue: torch.flatten(x, 1)
    feat = x2.shape[1]
    total = n * feat

    # Present a sublane/lane-dense [rows, 128] slab to the kernel.
    rows = pl.cdiv(total, LANE)
    rows_rounded = ((rows + SUB - 1) // SUB) * SUB          # multiple of 8
    block_rows = min(1024, rows_rounded)                     # <= 512 KiB/buffer
    rows_padded = ((rows_rounded + block_rows - 1) // block_rows) * block_rows
    padded_total = rows_padded * LANE

    flat = x2.reshape(-1)
    if padded_total != total:
        flat = jnp.pad(flat, (0, padded_total - total))
    slab = flat.reshape(rows_padded, LANE)

    seed_arr = jnp.array([seed], dtype=jnp.int32)
    num_blocks = rows_padded // block_rows

    out_slab = pl.pallas_call(
        functools.partial(_dropout_kernel, block_rows=block_rows),
        out_shape=jax.ShapeDtypeStruct(slab.shape, slab.dtype),
        grid_spec=pltpu.PrefetchScalarGridSpec(
            num_scalar_prefetch=1,                     # seed -> SMEM
            grid=(num_blocks,),
            in_specs=[pl.BlockSpec((block_rows, LANE),
                                   lambda i, seed: (i, 0))],
            out_specs=pl.BlockSpec((block_rows, LANE),
                                   lambda i, seed: (i, 0)),
        ),
        compiler_params=pltpu.CompilerParams(
            dimension_semantics=("parallel",)),
    )(seed_arr, slab)

    return out_slab.reshape(-1)[:total].reshape(n, feat)


if __name__ == "__main__":
    key = jax.random.PRNGKey(0)
    # Shape from the module: [1, 1024, 1, 1].
    x = jax.random.normal(key, (1, 1024, 1, 1), dtype=jnp.float32)

    y = flatten_dropout(x, seed=0)
    jax.block_until_ready(y)

    assert y.shape == (1, 1024), y.shape
    assert y.dtype == jnp.float32

    # Every output is either 0 (dropped) or input / (1 - p) (kept & scaled).
    xf = x.reshape(1, -1)
    ok = jnp.all((y == 0) | jnp.isclose(y, xf * SCALE, rtol=1e-6, atol=1e-6))
    assert bool(ok)

    # Drop fraction should be close to p = 0.2 (loose bound for 1024 samples).
    frac_dropped = float(jnp.mean((y == 0).astype(jnp.float32)))
    assert 0.10 < frac_dropped < 0.30, frac_dropped

    print("KERNEL_OK")
</pallas_src>

<mosaic_0001>
module attributes {stable_mosaic.version = 11 : i64} {
  func.func @_dropout_kernel(%arg0: i32, %arg1: memref<1xi32, #tpu.memory_space<smem>>, %arg2: memref<8x128xf32, #tpu.memory_space<vmem>>, %arg3: memref<8x128xf32, #tpu.memory_space<vmem>>) attributes {dimension_semantics = [#tpu.dimension_semantics<parallel>], iteration_bounds = array<i64: 1>, scalar_prefetch = 1 : i64, scratch_operands = 0 : i64, tpu.core_type = #tpu.core_type<tc>, window_params = [{transform_indices = @transform_0, window_bounds = array<i64: 8, 128>}, {transform_indices = @transform_1, window_bounds = array<i64: 8, 128>}]} {
    %0 = tpu.iota {dimensions = array<i32: 0>} : vector<8x128xi32>
    %1 = tpu.iota {dimensions = array<i32: 1>} : vector<8x128xi32>
    %c8_i32 = arith.constant 8 : i32
    %2 = arith.muli %arg0, %c8_i32 : i32
    %3 = vector.broadcast %2 : i32 to vector<8x128xi32>
    %4 = arith.addi %3, %0 : vector<8x128xi32>
    %c128_i32 = arith.constant 128 : i32
    %5 = vector.broadcast %c128_i32 : i32 to vector<8x128xi32>
    %6 = arith.muli %4, %5 : vector<8x128xi32>
    %7 = arith.addi %6, %1 : vector<8x128xi32>
    %c0 = arith.constant 0 : index
    %8 = memref.load %arg1[%c0] : memref<1xi32, #tpu.memory_space<smem>>
    %c-1640531527_i32 = arith.constant -1640531527 : i32
    %9 = arith.muli %8, %c-1640531527_i32 : i32
    %c2135587861_i32 = arith.constant 2135587861 : i32
    %10 = arith.addi %9, %c2135587861_i32 : i32
    %11 = vector.broadcast %10 : i32 to vector<8x128xi32>
    %12 = arith.xori %7, %11 : vector<8x128xi32>
    %c16_i32 = arith.constant 16 : i32
    %13 = vector.broadcast %c16_i32 : i32 to vector<8x128xi32>
    %14 = arith.shrui %12, %13 : vector<8x128xi32>
    %15 = arith.xori %12, %14 : vector<8x128xi32>
    %c-2048144789_i32 = arith.constant -2048144789 : i32
    %16 = vector.broadcast %c-2048144789_i32 : i32 to vector<8x128xi32>
    %17 = arith.muli %15, %16 : vector<8x128xi32>
    %c13_i32 = arith.constant 13 : i32
    %18 = vector.broadcast %c13_i32 : i32 to vector<8x128xi32>
    %19 = arith.shrui %17, %18 : vector<8x128xi32>
    %20 = arith.xori %17, %19 : vector<8x128xi32>
    %c-1028477387_i32 = arith.constant -1028477387 : i32
    %21 = vector.broadcast %c-1028477387_i32 : i32 to vector<8x128xi32>
    %22 = arith.muli %20, %21 : vector<8x128xi32>
    %c16_i32_0 = arith.constant 16 : i32
    %23 = vector.broadcast %c16_i32_0 : i32 to vector<8x128xi32>
    %24 = arith.shrui %22, %23 : vector<8x128xi32>
    %25 = arith.xori %22, %24 : vector<8x128xi32>
    %c858993459_i32 = arith.constant 858993459 : i32
    %26 = vector.broadcast %c858993459_i32 : i32 to vector<8x128xi32>
    %27 = arith.cmpi uge, %25, %26 : vector<8x128xi32>
    %28 = arith.extui %27 : vector<8x128xi1> to vector<8x128xi32>
    %29 = arith.sitofp %28 : vector<8x128xi32> to vector<8x128xf32>
    %c0_1 = arith.constant 0 : index
    %c0_2 = arith.constant 0 : index
    %30 = vector.load %arg2[%c0_1, %c0_2] : memref<8x128xf32, #tpu.memory_space<vmem>>, vector<8x128xf32>
    %cst = arith.constant 1.250000e+00 : f32
    %31 = vector.broadcast %cst : f32 to vector<8x128xf32>
    %32 = arith.mulf %29, %31 : vector<8x128xf32>
    %33 = arith.mulf %30, %32 : vector<8x128xf32>
    %c0_3 = arith.constant 0 : index
    %c0_4 = arith.constant 0 : index
    %34 = vector.load %arg3[%c0_3, %c0_4] : memref<8x128xf32, #tpu.memory_space<vmem>>, vector<8x128xf32>
    tpu.vector_store %arg3[%c0_3, %c0_4], %33 {strides = array<i32>} : memref<8x128xf32, #tpu.memory_space<vmem>>, vector<8x128xf32>,
    return
  }
  func.func @transform_0(%arg0: i32, %arg1: memref<1xi32, #tpu.memory_space<smem>>) -> (i32, i32) {
    %c0_i32 = arith.constant 0 : i32
    %c0_i32_0 = arith.constant 0 : i32
    return %arg0, %c0_i32 : i32, i32
  }
  func.func @transform_1(%arg0: i32, %arg1: memref<1xi32, #tpu.memory_space<smem>>) -> (i32, i32) {
    %c0_i32 = arith.constant 0 : i32
    %c0_i32_0 = arith.constant 0 : i32
    return %arg0, %c0_i32 : i32, i32
  }
}

</mosaic_0001>

<bundles_post_ra>
// kernel: tpu_custom_call.1
= control target key start
LH: loop header
LB: loop body
LE: loop exit
PB: predicated region body
PF: predicated region fallthrough
CT: control target
= control target key end

     0   :  { %8 = vsyncpa [#allocation5], 0  ;;  %s164_s0 = inlined_call_operand.<no memory space> [shape: s32[1], index: 0, kind: input, shape index: {}]   ;;  %s165_s1 = inlined_call_operand.hbm [shape: f32[8,128], index: 1, kind: input, shape index: {}]   ;;  %s166_s2 = inlined_call_operand.hbm [shape: f32[8,128], index: 2, kind: output, shape index: {}]  }
   0x1   :  { %9 = vsyncpa [#allocation6], 0  ;;  %s119_s9 = smov [#allocation4]   ;;  %s71_s13 = scalar_lea.hbm %s165_s1, 128 }
   0x2   :  { %s16_s10 = sshll.u32 %s119_s9, 4  ;;  %p72_p0 = scmp.ne.s32.totalorder %s165_s1, %s71_s13  ;;  %s17_s10 = int_to_ptr.vmem [resolvable:$true] %s16_s10 }
   0x3   :  { %p75_p1 = scmp.lt.u32.totalorder %s71_s13, %s165_s1 }
   0x5   :  { %p77_p2 = pnand %p75_p1, %p72_p0 }
   0x7   :  { %80 = shalt.err (!%p77_p2)
}
   0x8   :  { %s81_s18 = scalar_lea.vmem %s17_s10, 128  ;;  %p86_p4 = scmp.lt.s32.totalorder %s17_s10, %s17_s10 }
   0x9   :  { %p82_p3 = scmp.ne.s32.totalorder %s17_s10, %s81_s18  ;;  %p87_p5 = scmp.lt.s32.totalorder %s81_s18, %s81_s18 }
   0xb   :  { %p88_p6 = por %p87_p5, %p86_p4 }
   0xd   :  { %p89_p7 = pnand %p88_p6, %p82_p3 }
   0xf   :  { %92 = shalt.err (!%p89_p7)
}
  0x10   :  { %19 = dma.hbm_to_vmem [thread:$0]  %s165_s1, 128, %s17_s10, [#allocation5]  }
  0x11   :  { %115 = dma.done.wait [#allocation5], 128  }
  0x12   :  { %116 = vsyncadd [#allocation5], 4294967168  ;;  %v23_v0 = vlaneseq  ;;  %s33_s23 = smul.u32 2654435769, %s164_s0  ;;  %v120_v15 = vmov 0.0   ;;  %v48_v17 = vld [vmem:[#allocation4] sm:$0xff] }
  0x13   :  { %s121_s0 = smov [#allocation7]  }
  0x14   :  { %v24_v1 = vshrl.u32 %v23_v0, 7  ;;  %v26_v2 = vand.u32 127, %v23_v0  ;;  %s34_s24 = sadd.s32 2135587861, %s33_s23  ;;  %s58_s1 = sshll.u32 %s121_s0, 4  ;;  %s59_s1 = int_to_ptr.vmem [resolvable:$true] %s58_s1 }
  0x15   :  { %v35_v4 = vstv %s34_s24  ;;  %s93_s25 = scalar_lea.vmem %s59_s1, 128  ;;  %p98_p9 = scmp.lt.s32.totalorder %s59_s1, %s59_s1 }
  0x16   :  { %v30_v3 = vmul.u32 128, %v24_v1  ;;  %p94_p8 = scmp.ne.s32.totalorder %s59_s1, %s93_s25  ;;  %p99_p10 = scmp.lt.s32.totalorder %s93_s25, %s93_s25 }
  0x18   :  { %v31_v5 = vadd.s32 %v30_v3, %v26_v2  ;;  %p100_p11 = por %p99_p10, %p98_p9 }
  0x1a   :  { %v36_v6 = vxor.u32 %v35_v4, %v31_v5  ;;  %p101_p12 = pnand %p100_p11, %p94_p8 }
  0x1c   :  { %v37_v7 = vshrl.u32 %v36_v6, 16 }
  0x1e   :  { %v38_v8 = vxor.u32 %v37_v7, %v36_v6 }
  0x20   :  { %v39_v9 = vmul.u32 2246822507, %v38_v8 }
  0x22   :  { %v40_v10 = vshrl.u32 %v39_v9, 13 }
  0x24   :  { %v41_v11 = vxor.u32 %v40_v10, %v39_v9 }
  0x26   :  { %v42_v12 = vmul.u32 3266489909, %v41_v11 }
  0x28   :  { %v43_v13 = vshrl.u32 %v42_v12, 16 }
  0x2a   :  { %v44_v14 = vxor.u32 %v43_v13, %v42_v12 }
  0x2c   :  { %vm45_vm0 = vcmp.ge.u32.totalorder %v44_v14, 858993459 }
  0x2d   :  { %v67_v16 = vsel %vm45_vm0, 1.0, %v120_v15 }
  0x2e   :  { %v49_v18 = vmul.f32 1.25, %v67_v16 }
  0x30   :  { %v50_v19 = vmul.f32 %v49_v18, %v48_v17 }
  0x32   :  { %51 = vst [vmem:[#allocation7] sm:$0xff] %v50_v19 }
  0x33   :  { %104 = shalt.err (!%p101_p12)
}
  0x34   :  { %s105_s28 = scalar_lea.hbm %s166_s2, 128 }
  0x35   :  { %p106_p13 = scmp.ne.s32.totalorder %s166_s2, %s105_s28  ;;  %p109_p0 = scmp.lt.u32.totalorder %s105_s28, %s166_s2 }
  0x37   :  { %p111_p1 = pnand %p109_p0, %p106_p13 }
  0x39   :  { %114 = shalt.err (!%p111_p1)
}
  0x3a   :  { %61 = dma.vmem_to_hbm [thread:$0]  %s59_s1, 128, %s166_s2, [#allocation6]  }
  0x3b   :  { %117 = dma.done.wait [#allocation6], 128  }
  0x3c   :  { %118 = vsyncadd [#allocation6], 4294967168 }
  0x3d   :  { %65 = vsyncpa [#allocation5], 1 }
  0x3e   :  { %66 = vsyncpa [#allocation6], 1 }

</bundles_post_ra>
